<compile_context>
chip_gen: v5e
topology: v5e:2x2
jax: 0.10.0
libtpu: 0.0.40
codegen_flags: <defaults>
</compile_context>

<pallas_src>
import jax
import jax.numpy as jnp
from jax import lax
from jax.experimental import pallas as pl
from jax.experimental.pallas import tpu as pltpu


def cnn_kernel(x_ref, w1_ref, b1_ref, w2_ref, b2_ref, wf_ref, bf_ref,
               out_ref, xpad_ref):
    TB, L, Cin = x_ref.shape
    C1 = w1_ref.shape[2]

    # Build the zero-padded (pad=1) sequence window entirely in VMEM:
    # zero the two halo rows every step (scratch is per-core and persistent,
    # so do NOT gate this on program_id with a "parallel" grid), then copy the
    # unpadded block into rows 1..L.
    xpad_ref[:, 0:1, :] = jnp.zeros((TB, 1, Cin), xpad_ref.dtype)
    xpad_ref[:, L + 1:L + 2, :] = jnp.zeros((TB, 1, Cin), xpad_ref.dtype)
    xpad_ref[:, 1:L + 1, :] = x_ref[...]

    xp = xpad_ref[...]                       # (TB, L+2, Cin), compute dtype
    w1 = w1_ref[...]                         # (3, Cin, C1), same dtype as x

    # conv1 (k=3, pad=1) as 3 shifted matmuls, MXU with f32 accumulation.
    h = jnp.zeros((TB, L, C1), jnp.float32)
    for tap in range(3):
        h = h + lax.dot_general(
            xp[:, tap:tap + L, :], w1[tap],
            dimension_numbers=(((2,), (0,)), ((), ())),
            preferred_element_type=jnp.float32)
    h = jnp.maximum(h + b1_ref[...], 0.0)    # bias (1, C1) broadcasts, f32

    # AdaptiveAvgPool1d(1): mean over the sequence axis.
    pooled = jnp.mean(h, axis=1)             # (TB, C1) f32

    # conv2 on the length-1 zero-padded sequence == center-tap matmul, + ReLU.
    h2 = jnp.dot(pooled, w2_ref[...], preferred_element_type=jnp.float32)
    h2 = jnp.maximum(h2 + b2_ref[...], 0.0)  # (TB, C2)

    # fully-connected head
    out = jnp.dot(h2, wf_ref[...], preferred_element_type=jnp.float32)
    out_ref[...] = (out + bf_ref[...]).astype(out_ref.dtype)


def cnn_forward(x, params, *, block_b=512):
    """x: (B, L, 20) in float32 or bfloat16 (same input the PyTorch forward takes,
    channels-last). Streamed tensor + conv1 weights use x.dtype; math is f32."""
    w1, b1, w2, b2, wf, bf = params
    B, L, Cin = x.shape
    C1 = w1.shape[0]          # 16
    C2 = w2.shape[0]          # 32
    Cout = wf.shape[0]        # 4
    cdt = x.dtype             # compute dtype of the streamed activation

    # tiny layout glue (weights only — no full-activation rewrite in HBM)
    w1_t = jnp.transpose(w1, (2, 1, 0)).astype(cdt)    # (K=3, Cin, C1)
    w2_mid = w2[:, :, 1].T.astype(jnp.float32)         # (C1, C2) center tap
    wf_t = wf.T.astype(jnp.float32)                    # (C2, Cout)
    b1r = b1.reshape(1, C1).astype(jnp.float32)
    b2r = b2.reshape(1, C2).astype(jnp.float32)
    bfr = bf.reshape(1, Cout).astype(jnp.float32)

    # batch tile: either the whole batch, or a multiple of 8 (so the (TB, 4)
    # output block satisfies the sublane constraint)
    tb = B if B <= block_b else block_b
    if tb != B and tb % 8 != 0:
        tb = max(8, (tb // 8) * 8)
    grid = (pl.cdiv(B, tb),)

    flops = 2 * B * L * (3 * Cin) * C1 + 2 * B * C1 * C2 + 2 * B * C2 * Cout
    bytes_accessed = int(
        B * L * Cin * x.dtype.itemsize            # streamed activation
        + B * Cout * 4                            # output
        + 3 * Cin * C1 * jnp.dtype(cdt).itemsize  # conv1 weights
        + (C1 * C2 + C2 * Cout + C1 + C2 + Cout) * 4)

    return pl.pallas_call(
        cnn_kernel,
        out_shape=jax.ShapeDtypeStruct((B, Cout), jnp.float32),
        grid_spec=pltpu.PrefetchScalarGridSpec(
            num_scalar_prefetch=0,
            grid=grid,
            in_specs=[
                # streamed activation: tiled over batch, pipelined
                pl.BlockSpec((tb, L, Cin), lambda i: (i, 0, 0)),
                # parameters: constant block index -> fetched once, VMEM-resident
                pl.BlockSpec((3, Cin, C1), lambda i: (0, 0, 0)),
                pl.BlockSpec((1, C1), lambda i: (0, 0)),
                pl.BlockSpec((C1, C2), lambda i: (0, 0)),
                pl.BlockSpec((1, C2), lambda i: (0, 0)),
                pl.BlockSpec((C2, Cout), lambda i: (0, 0)),
                pl.BlockSpec((1, Cout), lambda i: (0, 0)),
            ],
            out_specs=pl.BlockSpec((tb, Cout), lambda i: (i, 0)),
            scratch_shapes=[pltpu.VMEM((tb, L + 2, Cin), cdt)],
        ),
        compiler_params=pltpu.CompilerParams(
            dimension_semantics=("parallel",),      # megacore on v7x
            vmem_limit_bytes=64 * 1024 * 1024,      # fits v7x's 64 MiB VMEM
        ),
        cost_estimate=pl.CostEstimate(
            flops=flops, transcendentals=0, bytes_accessed=bytes_accessed),
    )(x, w1_t, b1r, w2_mid, b2r, wf_t, bfr)


def _reference(x, params):
    """Pure-JAX reference with explicit conv1d, for a correctness check."""
    w1, b1, w2, b2, wf, bf = params
    xt = jnp.transpose(x, (0, 2, 1))                   # (B, 20, L)
    h = lax.conv_general_dilated(
        xt, w1, window_strides=(1,), padding=[(1, 1)],
        dimension_numbers=("NCH", "OIH", "NCH"))
    h = jax.nn.relu(h + b1[None, :, None])             # (B, 16, L)
    p = jnp.mean(h, axis=2, keepdims=True)             # (B, 16, 1)
    h2 = lax.conv_general_dilated(
        p, w2, window_strides=(1,), padding=[(1, 1)],
        dimension_numbers=("NCH", "OIH", "NCH"))
    h2 = jax.nn.relu(h2 + b2[None, :, None])           # (B, 32, 1)
    h2 = jnp.squeeze(h2, axis=-1)                      # (B, 32)
    return h2 @ wf.T + bf                              # (B, 4)


if __name__ == "__main__":
    key = jax.random.PRNGKey(0)
    ks = jax.random.split(key, 7)

    # deterministic synthetic parameters (PyTorch shapes)
    w1 = jax.random.normal(ks[1], (16, 20, 3), jnp.float32) * 0.1   # conv1.weight
    b1 = jax.random.normal(ks[2], (16,), jnp.float32) * 0.1         # conv1.bias
    w2 = jax.random.normal(ks[3], (32, 16, 3), jnp.float32) * 0.1   # conv2.weight
    b2 = jax.random.normal(ks[4], (32,), jnp.float32) * 0.1         # conv2.bias
    wf = jax.random.normal(ks[5], (4, 32), jnp.float32) * 0.1       # fc.weight
    bf = jax.random.normal(ks[6], (4,), jnp.float32) * 0.1          # fc.bias
    params = (w1, b1, w2, b2, wf, bf)

    # 1) small single-tile case (B, L, 20), f32
    B, L = 2, 16
    x = jax.random.normal(ks[0], (B, L, 20), jnp.float32)
    out = jax.block_until_ready(cnn_forward(x, params))
    ref = _reference(x, params)
    assert out.shape == (B, 4), out.shape
    assert jnp.allclose(out, ref, atol=1e-4, rtol=1e-4), (out, ref)

    # 2) multi-tile batch grid (exercises the pipelined / parallel path), f32
    B2 = 96
    x2 = jax.random.normal(jax.random.PRNGKey(1), (B2, L, 20), jnp.float32)
    out2 = jax.block_until_ready(cnn_forward(x2, params, block_b=32))
    ref2 = _reference(x2, params)
    assert out2.shape == (B2, 4), out2.shape
    assert jnp.allclose(out2, ref2, atol=1e-4, rtol=1e-4)

    # 3) bf16-streamed path (recommended deployment dtype for the activations)
    def _rt(a):  # bf16 round-trip, so the reference sees identically-rounded values
        return a.astype(jnp.bfloat16).astype(jnp.float32)
    out_bf = jax.block_until_ready(
        cnn_forward(x2.astype(jnp.bfloat16), params, block_b=32))
    ref_bf = _reference(_rt(x2), (_rt(w1), b1, w2, b2, wf, bf))
    assert jnp.allclose(out_bf, ref_bf, atol=1e-3, rtol=1e-3)

    print("KERNEL_OK")
</pallas_src>

<mosaic_0001>
module attributes {stable_mosaic.version = 11 : i64} {
  func.func @cnn_kernel(%arg0: i32, %arg1: memref<2x16x20xf32, #tpu.memory_space<vmem>>, %arg2: memref<3x20x16xf32, #tpu.memory_space<vmem>>, %arg3: memref<1x16xf32, #tpu.memory_space<vmem>>, %arg4: memref<16x32xf32, #tpu.memory_space<vmem>>, %arg5: memref<1x32xf32, #tpu.memory_space<vmem>>, %arg6: memref<32x4xf32, #tpu.memory_space<vmem>>, %arg7: memref<1x4xf32, #tpu.memory_space<vmem>>, %arg8: memref<2x4xf32, #tpu.memory_space<vmem>>, %arg9: memref<2x18x20xf32, #tpu.memory_space<vmem>>) attributes {dimension_semantics = [#tpu.dimension_semantics<parallel>], iteration_bounds = array<i64: 1>, scalar_prefetch = 0 : i64, scratch_operands = 1 : i64, tpu.core_type = #tpu.core_type<tc>, window_params = [{transform_indices = @transform_0, window_bounds = array<i64: 2, 16, 20>}, {pipeline_mode = #tpu.pipeline_mode<synchronous>, transform_indices = @transform_1, window_bounds = array<i64: 3, 20, 16>}, {pipeline_mode = #tpu.pipeline_mode<synchronous>, transform_indices = @transform_2, window_bounds = array<i64: 1, 16>}, {pipeline_mode = #tpu.pipeline_mode<synchronous>, transform_indices = @transform_3, window_bounds = array<i64: 16, 32>}, {pipeline_mode = #tpu.pipeline_mode<synchronous>, transform_indices = @transform_4, window_bounds = array<i64: 1, 32>}, {pipeline_mode = #tpu.pipeline_mode<synchronous>, transform_indices = @transform_5, window_bounds = array<i64: 32, 4>}, {pipeline_mode = #tpu.pipeline_mode<synchronous>, transform_indices = @transform_6, window_bounds = array<i64: 1, 4>}, {transform_indices = @transform_7, window_bounds = array<i64: 2, 4>}]} {
    %cst = arith.constant 0.000000e+00 : f32
    %0 = vector.broadcast %cst : f32 to vector<2x1x20xf32>
    %c0 = arith.constant 0 : index
    %c0_0 = arith.constant 0 : index
    %c0_1 = arith.constant 0 : index
    %1 = vector.load %arg9[%c0, %c0_0, %c0_1] : memref<2x18x20xf32, #tpu.memory_space<vmem>>, vector<2x1x20xf32>
    tpu.vector_store %arg9[%c0, %c0_0, %c0_1], %0 {strides = array<i32>} : memref<2x18x20xf32, #tpu.memory_space<vmem>>, vector<2x1x20xf32>,
    %cst_2 = arith.constant 0.000000e+00 : f32
    %2 = vector.broadcast %cst_2 : f32 to vector<2x1x20xf32>
    %c0_3 = arith.constant 0 : index
    %c17 = arith.constant 17 : index
    %c0_4 = arith.constant 0 : index
    %3 = vector.load %arg9[%c0_3, %c17, %c0_4] : memref<2x18x20xf32, #tpu.memory_space<vmem>>, vector<2x1x20xf32>
    tpu.vector_store %arg9[%c0_3, %c17, %c0_4], %2 {strides = array<i32>} : memref<2x18x20xf32, #tpu.memory_space<vmem>>, vector<2x1x20xf32>,
    %c0_5 = arith.constant 0 : index
    %c0_6 = arith.constant 0 : index
    %c0_7 = arith.constant 0 : index
    %4 = vector.load %arg1[%c0_5, %c0_6, %c0_7] : memref<2x16x20xf32, #tpu.memory_space<vmem>>, vector<2x16x20xf32>
    %c0_8 = arith.constant 0 : index
    %c1 = arith.constant 1 : index
    %c0_9 = arith.constant 0 : index
    %5 = vector.load %arg9[%c0_8, %c1, %c0_9] : memref<2x18x20xf32, #tpu.memory_space<vmem>>, vector<2x16x20xf32>
    tpu.vector_store %arg9[%c0_8, %c1, %c0_9], %4 {strides = array<i32>} : memref<2x18x20xf32, #tpu.memory_space<vmem>>, vector<2x16x20xf32>,
    %c0_10 = arith.constant 0 : index
    %c0_11 = arith.constant 0 : index
    %c0_12 = arith.constant 0 : index
    %6 = vector.load %arg9[%c0_10, %c0_11, %c0_12] : memref<2x18x20xf32, #tpu.memory_space<vmem>>, vector<2x18x20xf32>
    %c0_13 = arith.constant 0 : index
    %c0_14 = arith.constant 0 : index
    %c0_15 = arith.constant 0 : index
    %7 = vector.load %arg2[%c0_13, %c0_14, %c0_15] : memref<3x20x16xf32, #tpu.memory_space<vmem>>, vector<3x20x16xf32>
    %cst_16 = arith.constant 0.000000e+00 : f32
    %8 = vector.broadcast %cst_16 : f32 to vector<2x16x16xf32>
    %9 = vector.extract_strided_slice %6 {offsets = [0, 0, 0], sizes = [2, 16, 20], strides = [1, 1, 1]} : vector<2x18x20xf32> to vector<2x16x20xf32>
    %10 = vector.extract_strided_slice %7 {offsets = [0, 0, 0], sizes = [1, 20, 16], strides = [1, 1, 1]} : vector<3x20x16xf32> to vector<1x20x16xf32>
    %11 = vector.shape_cast %10 : vector<1x20x16xf32> to vector<20x16xf32>
    %cst_17 = arith.constant dense<0.000000e+00> : vector<2x16x16xf32>
    %12 = tpu.matmul %9, %11, %cst_17 {dimension_numbers = #tpu.dot_dimension_numbers<[2], [0], [0, 1], [1], [0, 0, 0, 1, 1, 1], [], []>} : vector<2x16x20xf32>, vector<20x16xf32>, vector<2x16x16xf32> -> vector<2x16x16xf32>
    %13 = arith.addf %8, %12 : vector<2x16x16xf32>
    %14 = vector.extract_strided_slice %6 {offsets = [0, 1, 0], sizes = [2, 16, 20], strides = [1, 1, 1]} : vector<2x18x20xf32> to vector<2x16x20xf32>
    %15 = vector.extract_strided_slice %7 {offsets = [1, 0, 0], sizes = [1, 20, 16], strides = [1, 1, 1]} : vector<3x20x16xf32> to vector<1x20x16xf32>
    %16 = vector.shape_cast %15 : vector<1x20x16xf32> to vector<20x16xf32>
    %cst_18 = arith.constant dense<0.000000e+00> : vector<2x16x16xf32>
    %17 = tpu.matmul %14, %16, %cst_18 {dimension_numbers = #tpu.dot_dimension_numbers<[2], [0], [0, 1], [1], [0, 0, 0, 1, 1, 1], [], []>} : vector<2x16x20xf32>, vector<20x16xf32>, vector<2x16x16xf32> -> vector<2x16x16xf32>
    %18 = arith.addf %13, %17 : vector<2x16x16xf32>
    %19 = vector.extract_strided_slice %6 {offsets = [0, 2, 0], sizes = [2, 16, 20], strides = [1, 1, 1]} : vector<2x18x20xf32> to vector<2x16x20xf32>
    %20 = vector.extract_strided_slice %7 {offsets = [2, 0, 0], sizes = [1, 20, 16], strides = [1, 1, 1]} : vector<3x20x16xf32> to vector<1x20x16xf32>
    %21 = vector.shape_cast %20 : vector<1x20x16xf32> to vector<20x16xf32>
    %cst_19 = arith.constant dense<0.000000e+00> : vector<2x16x16xf32>
    %22 = tpu.matmul %19, %21, %cst_19 {dimension_numbers = #tpu.dot_dimension_numbers<[2], [0], [0, 1], [1], [0, 0, 0, 1, 1, 1], [], []>} : vector<2x16x20xf32>, vector<20x16xf32>, vector<2x16x16xf32> -> vector<2x16x16xf32>
    %23 = arith.addf %18, %22 : vector<2x16x16xf32>
    %c0_20 = arith.constant 0 : index
    %c0_21 = arith.constant 0 : index
    %24 = vector.load %arg3[%c0_20, %c0_21] : memref<1x16xf32, #tpu.memory_space<vmem>>, vector<1x16xf32>
    %25 = vector.shape_cast %24 : vector<1x16xf32> to vector<1x1x16xf32>
    %26 = vector.broadcast %25 : vector<1x1x16xf32> to vector<2x16x16xf32>
    %27 = arith.addf %23, %26 : vector<2x16x16xf32>
    %cst_22 = arith.constant 0.000000e+00 : f32
    %28 = vector.broadcast %cst_22 : f32 to vector<2x16x16xf32>
    %29 = arith.maximumf %27, %28 : vector<2x16x16xf32>
    %cst_23 = arith.constant dense<0.000000e+00> : vector<2x16xf32>
    %30 = vector.multi_reduction <add>, %29, %cst_23 [1] : vector<2x16x16xf32> to vector<2x16xf32>
    %cst_24 = arith.constant 1.600000e+01 : f32
    %31 = vector.broadcast %cst_24 : f32 to vector<2x16xf32>
    %32 = arith.divf %30, %31 : vector<2x16xf32>
    %c0_25 = arith.constant 0 : index
    %c0_26 = arith.constant 0 : index
    %33 = vector.load %arg4[%c0_25, %c0_26] : memref<16x32xf32, #tpu.memory_space<vmem>>, vector<16x32xf32>
    %cst_27 = arith.constant dense<0.000000e+00> : vector<2x32xf32>
    %34 = tpu.matmul %32, %33, %cst_27 {dimension_numbers = #tpu.dot_dimension_numbers<[1], [0], [0], [1], [0, 0, 1, 1], [], []>} : vector<2x16xf32>, vector<16x32xf32>, vector<2x32xf32> -> vector<2x32xf32>
    %c0_28 = arith.constant 0 : index
    %c0_29 = arith.constant 0 : index
    %35 = vector.load %arg5[%c0_28, %c0_29] : memref<1x32xf32, #tpu.memory_space<vmem>>, vector<1x32xf32>
    %36 = vector.broadcast %35 : vector<1x32xf32> to vector<2x32xf32>
    %37 = arith.addf %34, %36 : vector<2x32xf32>
    %cst_30 = arith.constant 0.000000e+00 : f32
    %38 = vector.broadcast %cst_30 : f32 to vector<2x32xf32>
    %39 = arith.maximumf %37, %38 : vector<2x32xf32>
    %c0_31 = arith.constant 0 : index
    %c0_32 = arith.constant 0 : index
    %40 = vector.load %arg6[%c0_31, %c0_32] : memref<32x4xf32, #tpu.memory_space<vmem>>, vector<32x4xf32>
    %cst_33 = arith.constant dense<0.000000e+00> : vector<2x4xf32>
    %41 = tpu.matmul %39, %40, %cst_33 {dimension_numbers = #tpu.dot_dimension_numbers<[1], [0], [0], [1], [0, 0, 1, 1], [], []>} : vector<2x32xf32>, vector<32x4xf32>, vector<2x4xf32> -> vector<2x4xf32>
    %c0_34 = arith.constant 0 : index
    %c0_35 = arith.constant 0 : index
    %42 = vector.load %arg7[%c0_34, %c0_35] : memref<1x4xf32, #tpu.memory_space<vmem>>, vector<1x4xf32>
    %43 = vector.broadcast %42 : vector<1x4xf32> to vector<2x4xf32>
    %44 = arith.addf %41, %43 : vector<2x4xf32>
    %c0_36 = arith.constant 0 : index
    %c0_37 = arith.constant 0 : index
    %45 = vector.load %arg8[%c0_36, %c0_37] : memref<2x4xf32, #tpu.memory_space<vmem>>, vector<2x4xf32>
    tpu.vector_store %arg8[%c0_36, %c0_37], %44 {strides = array<i32>} : memref<2x4xf32, #tpu.memory_space<vmem>>, vector<2x4xf32>,
    return
  }
  func.func @transform_0(%arg0: i32) -> (i32, i32, i32) {
    %c0_i32 = arith.constant 0 : i32
    %c0_i32_0 = arith.constant 0 : i32
    %c0_i32_1 = arith.constant 0 : i32
    return %arg0, %c0_i32, %c0_i32_0 : i32, i32, i32
  }
  func.func @transform_1(%arg0: i32) -> (i32, i32, i32) {
    %c0_i32 = arith.constant 0 : i32
    %c0_i32_0 = arith.constant 0 : i32
    %c0_i32_1 = arith.constant 0 : i32
    %c0_i32_2 = arith.constant 0 : i32
    return %c0_i32, %c0_i32_0, %c0_i32_1 : i32, i32, i32
  }
  func.func @transform_2(%arg0: i32) -> (i32, i32) {
    %c0_i32 = arith.constant 0 : i32
    %c0_i32_0 = arith.constant 0 : i32
    %c0_i32_1 = arith.constant 0 : i32
    return %c0_i32, %c0_i32_0 : i32, i32
  }
  func.func @transform_3(%arg0: i32) -> (i32, i32) {
    %c0_i32 = arith.constant 0 : i32
    %c0_i32_0 = arith.constant 0 : i32
    %c0_i32_1 = arith.constant 0 : i32
    return %c0_i32, %c0_i32_0 : i32, i32
  }
  func.func @transform_4(%arg0: i32) -> (i32, i32) {
    %c0_i32 = arith.constant 0 : i32
    %c0_i32_0 = arith.constant 0 : i32
    %c0_i32_1 = arith.constant 0 : i32
    return %c0_i32, %c0_i32_0 : i32, i32
  }
  func.func @transform_5(%arg0: i32) -> (i32, i32) {
    %c0_i32 = arith.constant 0 : i32
    %c0_i32_0 = arith.constant 0 : i32
    %c0_i32_1 = arith.constant 0 : i32
    return %c0_i32, %c0_i32_0 : i32, i32
  }
  func.func @transform_6(%arg0: i32) -> (i32, i32) {
    %c0_i32 = arith.constant 0 : i32
    %c0_i32_0 = arith.constant 0 : i32
    %c0_i32_1 = arith.constant 0 : i32
    return %c0_i32, %c0_i32_0 : i32, i32
  }
  func.func @transform_7(%arg0: i32) -> (i32, i32) {
    %c0_i32 = arith.constant 0 : i32
    %c0_i32_0 = arith.constant 0 : i32
    return %arg0, %c0_i32 : i32, i32
  }
}

</mosaic_0001>

<bundles_post_ra>
// kernel: tpu_custom_call.1
= control target key start
LH: loop header
LB: loop body
LE: loop exit
PB: predicated region body
PF: predicated region fallthrough
CT: control target
= control target key end

     0   :  { %vm81_vm0 = vcmask 1043456   ;;  %vm27_vm1 = vcmask 155648   ;;  %v383_v6 = vmov 0.0   ;;  %vm36_vm2 = vcmask 162816   ;;  %s528_s0 = inlined_call_operand.vmem [shape: f32[2,16,20], index: 0, kind: input, shape index: {}]   ;;  %s529_s1 = inlined_call_operand.vmem [shape: f32[3,20,16], index: 1, kind: input, shape index: {}]   ;;  %s530_s2 = inlined_call_operand.vmem [shape: f32[1,16], index: 2, kind: input, shape index: {}]   ;;  %s531_s3 = inlined_call_operand.vmem [shape: f32[16,32], index: 3, kind: input, shape index: {}]   ;;  %s532_s4 = inlined_call_operand.vmem [shape: f32[1,32], index: 4, kind: input, shape index: {}]   ;;  %s533_s5 = inlined_call_operand.vmem [shape: f32[32,4], index: 5, kind: input, shape index: {}]   ;;  %s534_s6 = inlined_call_operand.vmem [shape: f32[1,4], index: 6, kind: input, shape index: {}]   ;;  %s535_s7 = inlined_call_operand.hbm [shape: f32[2,4], index: 7, kind: output, shape index: {}]  }
   0x1   :  { %v55_v0 = vld [vmem:[%s529_s1 + $0x40] sm:$0xf]  ;;  %v54_v1 = vld [vmem:[%s529_s1 + $0x38] sm:$0xff]  ;;  %v52_v2 = vld [vmem:[%s529_s1 + $0x28] sm:$0xf] }
   0x2   :  { %342 = vmatpush.msk.msra.mxu2 %vm81_vm0, %v55_v0  ;;  %332 = vmatpush.msk.msra.mxu0 %vm81_vm0, %v52_v2  ;;  %v49_v3 = vld [vmem:[%s529_s1 + $0x10] sm:$0xf]  ;;  %v32_v4 = vld [vmem:[%s528_s0] sm:$0xff]  ;;  %28 = vst.msk [vmem:[#allocation2] sm:$0x1] %vm27_vm1, %v383_v6  ;;  %v33_v7 = vld [vmem:[%s528_s0 + $0x8] sm:$0xff] }
   0x3   :  { %337 = vmatpush.msk.msra.mxu1 %vm81_vm0, %v49_v3  ;;  %v53_v5 = vld [vmem:[%s529_s1 + $0x30] sm:$0xff]  ;;  %v51_v8 = vld [vmem:[%s529_s1 + $0x20] sm:$0xff]  ;;  %37 = vst.msk [vmem:[#allocation2 + $0x1] sm:$0xff] %vm36_vm2, %v32_v4  ;;  %v48_v9 = vld [vmem:[%s529_s1 + $0x8] sm:$0xff] }
   0x4   :  { %190 = vmatpush.msra.mxu2 %v54_v1  ;;  %99 = vmatpush.msra.mxu0 %v51_v8  ;;  %v50_v10 = vld [vmem:[%s529_s1 + $0x18] sm:$0xff]  ;;  %v47_v11 = vld [vmem:[%s529_s1] sm:$0xff]  ;;  %38 = vst.msk [vmem:[#allocation2 + $0x9] sm:$0xff] %vm36_vm2, %v33_v7  ;;  %v34_v12 = vld [vmem:[%s528_s0 + $0x10] sm:$0xff] }
   0x5   :  { %139 = vmatpush.msra.mxu1 %v48_v9  ;;  %29 = vst.msk [vmem:[#allocation2 + $0x18] sm:$0x1] %vm27_vm1, %v383_v6  ;;  %v35_v13 = vld [vmem:[%s528_s0 + $0x18] sm:$0xff] }
   0x6   :  { %191 = vmatpush.msra.mxu2 %v53_v5  ;;  %100 = vmatpush.msra.mxu0 %v50_v10  ;;  %30 = vst.msk [vmem:[#allocation2 + $0x11] sm:$0x1] %vm27_vm1, %v383_v6 }
   0x7   :  { %140 = vmatpush.msra.mxu1 %v47_v11 }
   0x8   :  { %12 = vsyncpa [#allocation4], 0  ;;  %31 = vst.msk [vmem:[#allocation2 + $0x29] sm:$0x1] %vm27_vm1, %v383_v6  ;;  %vm154_vm3 = vcmask 1045504   ;;  %vm62_vm4 = vcmask 1046528  }
   0x9   :  { %39 = vst.msk [vmem:[#allocation2 + $0x19] sm:$0xff] %vm36_vm2, %v34_v12  ;;  %v352_v47 = vld [vmem:[%s530_s2] ss:$0 sm:$0xff]  ;;  %v250_v51 = vld [vmem:[%s531_s3 + $0x8] sm:$0xff]  ;;  %vm221_vm5 = vcmask 130048   ;;  %v285_v63 = vld [vmem:[%s533_s5 + $0x18] sm:$0xff] }
   0xa   :  { %40 = vst.msk [vmem:[#allocation2 + $0x21] sm:$0xff] %vm36_vm2, %v35_v13  ;;  %v41_v14 = vld [vmem:[#allocation2] sm:$0xff]  ;;  %275 = vmatpush.msra.mxu3 %v250_v51  ;;  %v284_v0 = vld [vmem:[%s533_s5 + $0x10] sm:$0xff]  ;;  %v384_v4 = vmov 16.0   ;;  %vm257_vm7 = vcmask 1041409   ;;  %vm290_vm8 = vcmask 261120  }
   0xb   :  { %v42_v15 = vld [vmem:[#allocation2 + $0x8] sm:$0xff]  ;;  %v155_v16 = vrot.slane %v41_v14, 2  ;;  %v63_v17 = vrot.slane %v41_v14, 1  ;;  %338 = vmatmul.msk.f32.vlgmr.msra.gmra.mxu1 %vm36_vm2, %v41_v14  ;;  %v249_v52 = vld [vmem:[%s531_s3] sm:$0xff]  ;;  %355 = vrcp.f32 %v384_v4  ;;  %s385_s18 = smov [#allocation3]   ;;  %vm314_vm9 = vcmask 25600  }
   0xc   :  { %v156_v18 = vrot.slane %v42_v15, 2  ;;  %v64_v19 = vrot.slane %v42_v15, 1  ;;  %276 = vmatpush.msra.mxu3 %v249_v52  ;;  %s321_s19 = sshll.u32 %s385_s18, 4  ;;  %s322_s19 = int_to_ptr.vmem [resolvable:$true] %s321_s19 }
   0xd   :  { %v43_v20 = vld [vmem:[#allocation2 + $0x10] sm:$0x3] }
   0xe   :  { %v157_v21 = vsel %vm154_vm3, %v155_v16, %v156_v18  ;;  %v65_v22 = vsel %vm62_vm4, %v63_v17, %v64_v19  ;;  %v158_v23 = vrot.slane %v43_v20, 2  ;;  %v66_v24 = vrot.slane %v43_v20, 1  ;;  %306 = vmatpush.msrb.mxu3 %v285_v63 }
   0xf   :  { %343 = vmatmul.msk.f32.vlgmr.msra.gmra.mxu2 %vm36_vm2, %v157_v21  ;;  %333 = vmatmul.msk.f32.vlgmr.msra.gmra.mxu0 %vm36_vm2, %v65_v22 }
  0x10   :  { %v159_v25 = vsel %vm154_vm3, %v156_v18, %v158_v23  ;;  %v67_v26 = vsel %vm62_vm4, %v64_v19, %v66_v24  ;;  %v44_v27 = vld [vmem:[#allocation2 + $0x18] sm:$0xff]  ;;  %307 = vmatpush.msrb.mxu3 %v284_v0 }
  0x11   :  { %v45_v28 = vld [vmem:[#allocation2 + $0x20] sm:$0xff]  ;;  %v160_v29 = vrot.slane %v44_v27, 2  ;;  %v68_v31 = vrot.slane %v44_v27, 1  ;;  %v46_v35 = vld [vmem:[#allocation2 + $0x28] sm:$0x3]  ;;  %v356_v9 = vpop.eup %355 }
  0x12   :  { %v161_v30 = vrot.slane %v45_v28, 2  ;;  %v69_v32 = vrot.slane %v45_v28, 1  ;;  %v163_v36 = vrot.slane %v46_v35, 2  ;;  %v71_v37 = vrot.slane %v46_v35, 1 }
  0x13   :  { %339 = vmatmul.msk.f32.gmra.mxu1 %vm36_vm2, %v42_v15  ;;  %v241_v15 = vmul.f32 16.0, %v356_v9  ;;  %vm245_vm6 = vweird.f32 %v356_v9 }
  0x14   :  { %v162_v33 = vsel %vm154_vm3, %v160_v29, %v161_v30  ;;  %v70_v34 = vsel %vm62_vm4, %v68_v31, %v69_v32  ;;  %v164_v38 = vsel %vm154_vm3, %v161_v30, %v163_v36  ;;  %v72_v39 = vsel %vm62_vm4, %v69_v32, %v71_v37  ;;  %v283_v37 = vld [vmem:[%s533_s5 + $0x8] sm:$0xff] }
  0x15   :  { %v242_v20 = vsub.f32 1.0, %v241_v15  ;;  %308 = vmatpush.msrb.mxu3 %v283_v37 }
  0x17   :  { %344 = vmatmul.msk.f32.gmra.mxu2 %vm36_vm2, %v159_v25  ;;  %334 = vmatmul.msk.f32.gmra.mxu0 %vm36_vm2, %v67_v26  ;;  %v243_v24 = vmul.f32 %v356_v9, %v242_v20 }
  0x1b   :  { %340 = vmatmul.msk.f32.gmra.mxu1 %vm36_vm2, %v44_v27 }
  0x1f   :  { %345 = vmatmul.msk.f32.gmra.mxu2 %vm36_vm2, %v162_v33  ;;  %335 = vmatmul.msk.f32.gmra.mxu0 %vm36_vm2, %v70_v34 }
  0x23   :  { %341 = vmatmul.msk.f32.gmra.mxu1 %vm36_vm2, %v45_v28  ;;  %v244_v28 = vadd.f32 %v356_v9, %v243_v24 }
  0x25   :  { %v246_v32 = vsel %vm245_vm6, %v356_v9, %v244_v28 }
  0x27   :  { %346 = vmatmul.msk.f32.gmra.mxu2 %vm36_vm2, %v164_v38  ;;  %336 = vmatmul.msk.f32.gmra.mxu0 %vm36_vm2, %v72_v39  ;;  %v282_v38 = vld [vmem:[%s533_s5] sm:$0xff]  ;;  %s323_s5 = sshll.u32 %s535_s7, 4  ;;  %s324_s5 = int_to_ptr.hbm [resolvable:$true] %s323_s5 }
  0x28   :  { %309 = vmatpush.msrb.mxu3 %v282_v38  ;;  %v353_v39 = vld [vmem:[%s532_s4] ss:$0 sm:$0xff] }
  0x88   :  { %v142_v40 = vpop.f32.mrf.mxu1 }
  0x8c   :  { %v102_v41 = vpop.f32.mrf.mxu0 }
  0x8d   :  { %v143_v44 = vadd.f32 %v142_v40, %v102_v41 }
  0x90   :  { %v145_v42 = vpop.f32.mrf.mxu1 }
  0x92   :  { %v193_v43 = vpop.f32.mrf.mxu2 }
  0x93   :  { %v205_v46 = vadd.f32 %v193_v43, %v143_v44  ;;  %v354_v43 = vld [vmem:[%s534_s6] ss:$0 sm:$0xff] }
  0x94   :  { %v105_v45 = vpop.f32.mrf.mxu0 }
  0x95   :  { %v146_v48 = vadd.f32 %v145_v42, %v105_v45  ;;  %v213_v53 = vadd.f32 %v352_v47, %v205_v46 }
  0x97   :  { %v217_v57 = vmax.f32 %v213_v53, 0.0 }
  0x98   :  { %v148_v50 = vpop.f32.mrf.mxu1 }
  0x99   :  { %v222_v62 = vsel %vm221_vm5, %v217_v57, 0.0 }
  0x9a   :  { %v196_v49 = vpop.f32.mrf.mxu2 }
  0x9b   :  { %v206_v54 = vadd.f32 %v196_v49, %v146_v48 }
  0x9c   :  { %v108_v55 = vpop.f32.mrf.mxu0 }
  0x9d   :  { %v214_v56 = vadd.f32 %v352_v47, %v206_v54  ;;  %v149_v60 = vadd.f32 %v148_v50, %v108_v55 }
  0x9f   :  { %v218_v58 = vmax.f32 %v214_v56, 0.0 }
  0xa0   :  { %v151_v3 = vpop.f32.mrf.mxu1 }
  0xa1   :  { %v223_v59 = vsel %vm221_vm5, %v218_v58, 0.0 }
  0xa2   :  { %v199_v61 = vpop.f32.mrf.mxu2  ;;  %v224_v1 = vadd.f32 %v223_v59, %v222_v62 }
  0xa3   :  { %v207_v5 = vadd.f32 %v199_v61, %v149_v60 }
  0xa4   :  { %v111_v2 = vpop.f32.mrf.mxu0  ;;  %v225_v7 = vrot.slane %v224_v1, 4 }
  0xa5   :  { %v152_v6 = vadd.f32 %v151_v3, %v111_v2  ;;  %v215_v8 = vadd.f32 %v352_v47, %v207_v5 }
  0xa6   :  { %v226_v12 = vadd.f32 %v225_v7, %v224_v1 }
  0xa7   :  { %v219_v13 = vmax.f32 %v215_v8, 0.0 }
  0xa8   :  { %v227_v17 = vrot.slane %v226_v12, 2 }
  0xa9   :  { %v231_v18 = vsel %vm221_vm5, %v219_v13, 0.0 }
  0xaa   :  { %v202_v10 = vpop.f32.mrf.mxu2  ;;  %v228_v22 = vadd.f32 %v227_v17, %v226_v12 }
  0xab   :  { %v208_v11 = vadd.f32 %v202_v10, %v152_v6 }
  0xac   :  { %v229_v27 = vrot.slane %v228_v22, 1 }
  0xad   :  { %v216_v14 = vadd.f32 %v352_v47, %v208_v11 }
  0xae   :  { %v230_v30 = vadd.f32 %v229_v27, %v228_v22 }
  0xaf   :  { %v220_v16 = vmax.f32 %v216_v14, 0.0 }
  0xb0   :  { %v247_v34 = vmul.f32 %v246_v32, %v230_v30 }
  0xb1   :  { %v232_v19 = vsel %vm221_vm5, %v220_v16, 0.0 }
  0xb2   :  { %v233_v21 = vadd.f32 %v232_v19, %v231_v18 }
  0xb4   :  { %v234_v23 = vrot.slane %v233_v21, 4 }
  0xb6   :  { %v235_v25 = vadd.f32 %v234_v23, %v233_v21 }
  0xb8   :  { %v236_v26 = vrot.slane %v235_v25, 2 }
  0xba   :  { %v237_v29 = vadd.f32 %v236_v26, %v235_v25 }
  0xbc   :  { %v238_v31 = vrot.slane %v237_v29, 1 }
  0xbe   :  { %v239_v33 = vadd.f32 %v238_v31, %v237_v29 }
  0xc0   :  { %v248_v35 = vmul.f32 %v246_v32, %v239_v33 }
  0xc2   :  { %v258_v36 = vsel %vm257_vm7, %v248_v35, %v247_v34 }
  0xc3   :  { %347 = vmatmul.msk.f32.vlgmr.msra.gmra.mxu3 %vm221_vm5, %v258_v36 }
 0x146   :  { %v278_v40 = vpop.f32.mrf.mxu3 }
 0x147   :  { %v279_v41 = vadd.f32 %v353_v39, %v278_v40 }
 0x149   :  { %v281_v42 = vmax.f32 %v279_v41, 0.0 }
 0x14b   :  { %348 = vmatmul.msk.f32.vlgmr.msrb.gmra.mxu3 %vm290_vm8, %v281_v42 }
 0x1ce   :  { %v311_v44 = vpop.f32.mrf.mxu3 }
 0x1cf   :  { %v312_v45 = vadd.f32 %v354_v43, %v311_v44 }
 0x1d1   :  { %315 = vst.msk [vmem:[#allocation3] sm:$0x3] %vm314_vm9, %v312_v45 }
 0x1d2   :  { %326 = dma.vmem_to_hbm [thread:$0]  %s322_s19, 32, %s324_s5, [#allocation4]  }
 0x1d3   :  { %381 = dma.done.wait [#allocation4], 32  }
 0x1d4   :  { %382 = vsyncadd [#allocation4], 4294967264 }
 0x1d5   :  { %331 = vsyncpa [#allocation4], 1 }

</bundles_post_ra>
